<compile_context>
chip_gen: v7x
topology: tpu7x:2x2x1
jax: 0.10.0
libtpu: 0.0.40
codegen_flags: <defaults>
</compile_context>

<pallas_src>
import jax
import jax.numpy as jnp
from jax import lax
from jax.experimental import pallas as pl
from jax.experimental.pallas import tpu as pltpu

MARGIN = 0.0
EPS = 1e-8


# --------------------------------------------------------------------------
# Fused kernel: (mean over regions/words + l2norm) gridded over batch tiles,
# plus the NxN contrastive-loss reduction on the last grid step.
# --------------------------------------------------------------------------
def _make_fused_kernel(n, r, w, d, tile_n):
    inv_r = 1.0 / float(r)
    inv_w = 1.0 / float(w)

    def kernel(im_ref, s_ref, out_ref, img_sc, cap_sc):
        i = pl.program_id(0)

        # ---- Stage 1: mean over regions/words as lane-slice adds (VPU) ----
        im = im_ref[...].astype(jnp.float32)    # (tile_n, r*d), lane-dense
        cp = s_ref[...].astype(jnp.float32)     # (tile_n, w*d), lane-dense

        avg_img = im[:, 0:d]
        for k in range(1, r):                    # static unrolled lane slices
            avg_img = avg_img + im[:, k * d:(k + 1) * d]
        avg_img = avg_img * inv_r

        avg_cap = cp[:, 0:d]
        for k in range(1, w):
            avg_cap = avg_cap + cp[:, k * d:(k + 1) * d]
        avg_cap = avg_cap * inv_w

        img_ss = jnp.sum(avg_img * avg_img, axis=1, keepdims=True)
        cap_ss = jnp.sum(avg_cap * avg_cap, axis=1, keepdims=True)
        # EUP rsqrt (own VLIW slot); tiny guard reproduces torch's
        # x / (sqrt(sum x^2) + eps) behaviour for all-zero rows (-> 0).
        img_n = avg_img * lax.rsqrt(img_ss + EPS * EPS)
        cap_n = avg_cap * lax.rsqrt(cap_ss + EPS * EPS)

        start = pl.multiple_of(i * tile_n, tile_n)
        img_sc[pl.ds(start, tile_n), :] = img_n
        cap_sc[pl.ds(start, tile_n), :] = cap_n

        # ---- Stage 2 (fused): NxN loss on the last grid step ----
        @pl.when(i == pl.num_programs(0) - 1)
        def _():
            a_img = img_sc[...]                  # (n, d), f32, l2-normalized
            a_cap = cap_sc[...]                  # (n, d), f32

            # scores[i, j] = <a_img[i], a_cap[j]>; contract last dims on both
            # operands so no explicit transpose is materialized for the MXU.
            scores = lax.dot_general(
                a_img, a_cap,
                dimension_numbers=(((1,), (1,)), ((), ())),
                preferred_element_type=jnp.float32)          # (n, n)

            # diag computed on the VPU, independent of the MXU drain.
            diag = jnp.sum(a_img * a_cap, axis=1, keepdims=True)   # (n, 1)

            row_ids = lax.broadcasted_iota(jnp.int32, (n, n), 0)
            col_ids = lax.broadcasted_iota(jnp.int32, (n, n), 1)
            eye = row_ids == col_ids

            cost_s = jnp.where(eye, 0.0,
                               jnp.maximum(MARGIN + scores - diag, 0.0))
            cost_im = jnp.where(eye, 0.0,
                                jnp.maximum(MARGIN + scores - diag.T, 0.0))

            # max_violation: row-max for cost_s, column-max for cost_im, sum.
            loss = (jnp.sum(jnp.max(cost_s, axis=1, keepdims=True))
                    + jnp.sum(jnp.max(cost_im, axis=0, keepdims=True)))
            out_ref[0, 0] = loss

    return kernel


def _vmem_capacity_bytes():
    try:
        return int(pltpu.get_tpu_info().vmem_capacity_bytes)
    except Exception:
        return 64 << 20   # conservative (v7x-sized) default


def _pick_tile_n(n, bytes_per_row, budget_bytes):
    """Largest 8*2^k batch tile that divides n and keeps the double-buffered
    input blocks within budget_bytes.  Falls back to a single tile (= n) when
    n is not a multiple of 8 (then the block equals the full array extent)."""
    if n % 8 != 0 or n <= 8:
        return n
    tile = 8
    while (n % (tile * 2) == 0
           and 2 * (tile * 2) * bytes_per_row <= budget_bytes):
        tile *= 2
    return tile


def contrastive_loss1(im, s, s_l=None):
    """im: (N, R, D) image regions, s: (N, W, D) caption words, s_l unused."""
    del s_l  # see TODO(synk) at top of file
    n, r, d = im.shape
    _, w, _ = s.shape

    # Lane-dense 2D views: (N, R*D) / (N, W*D) — no sublane padding of R/W.
    im_flat = im.reshape(n, r * d)
    s_flat = s.reshape(n, w * d)

    itemsize = max(im.dtype.itemsize, s.dtype.itemsize)
    vmem_cap = _vmem_capacity_bytes()
    # <=32 MiB scoped request on 64 MiB-VMEM parts (v7x), <=64 MiB otherwise.
    cap_limit = (32 << 20) if vmem_cap <= (64 << 20) else (64 << 20)

    scratch_bytes = 2 * n * d * 4                 # two (n, d) f32 scratch bufs
    stage2_bytes = 4 * n * n * 4                  # scores + cost mats + temps
    bytes_per_row = (r + w) * d * itemsize        # combined per-sample bytes
    tile_budget = max(cap_limit - scratch_bytes - stage2_bytes - (2 << 20),
                      1 << 20)
    tile_n = _pick_tile_n(n, bytes_per_row, tile_budget)
    grid = (n // tile_n,)

    vmem_limit = int(min(
        max(2 * tile_n * bytes_per_row          # double-buffered inputs
            + scratch_bytes + stage2_bytes + (4 << 20),
            16 << 20),
        cap_limit))

    kernel = _make_fused_kernel(n, r, w, d, tile_n)

    loss = pl.pallas_call(
        kernel,
        out_shape=jax.ShapeDtypeStruct((1, 1), jnp.float32),
        grid=grid,
        in_specs=[pl.BlockSpec((tile_n, r * d), lambda i: (i, 0)),
                  pl.BlockSpec((tile_n, w * d), lambda i: (i, 0))],
        out_specs=pl.BlockSpec(memory_space=pltpu.MemorySpace.SMEM),
        scratch_shapes=[pltpu.VMEM((n, d), jnp.float32),
                        pltpu.VMEM((n, d), jnp.float32)],
        compiler_params=pltpu.CompilerParams(
            dimension_semantics=("arbitrary",),   # scratch carried across steps
            vmem_limit_bytes=vmem_limit),
    )(im_flat, s_flat)
    return loss[0, 0]


def _reference_loss(im, s):
    """Pure-JAX reference for sanity checking."""
    avg_img = jnp.mean(im.astype(jnp.float32), axis=1)
    avg_cap = jnp.mean(s.astype(jnp.float32), axis=1)
    avg_img = avg_img / (jnp.sqrt(jnp.sum(avg_img**2, axis=1, keepdims=True)) + EPS)
    avg_cap = avg_cap / (jnp.sqrt(jnp.sum(avg_cap**2, axis=1, keepdims=True)) + EPS)
    scores = jnp.einsum('id,jd->ij', avg_img, avg_cap,
                        precision=lax.Precision.HIGHEST)
    diag = jnp.diag(scores)[:, None]
    eye = jnp.eye(scores.shape[0], dtype=bool)
    cost_s = jnp.where(eye, 0.0, jnp.maximum(MARGIN + scores - diag, 0.0))
    cost_im = jnp.where(eye, 0.0, jnp.maximum(MARGIN + scores - diag.T, 0.0))
    return jnp.sum(jnp.max(cost_s, axis=1)) + jnp.sum(jnp.max(cost_im, axis=0))


if __name__ == "__main__":
    key = jax.random.PRNGKey(0)
    k_im, k_s = jax.random.split(key)
    # batch=16, n_regions=4, max_n_word=6, feat_dim=128 (lane-dense blocks)
    N, R, W, D = 16, 4, 6, 128
    im = jax.random.normal(k_im, (N, R, D), dtype=jnp.float32)
    s = jax.random.normal(k_s, (N, W, D), dtype=jnp.float32)
    s_l = jnp.full((N,), W, dtype=jnp.int32)   # caption lengths (unused by forward)

    loss = contrastive_loss1(im, s, s_l)
    jax.block_until_ready(loss)

    ref = _reference_loss(im, s)
    assert jnp.allclose(loss, ref, atol=2e-3, rtol=2e-3), (loss, ref)
    print("KERNEL_OK")
</pallas_src>

<mosaic_0001>
module attributes {stable_mosaic.version = 11 : i64} {
  func.func @kernel(%arg0: i32, %arg1: memref<16x512xf32, #tpu.memory_space<vmem>>, %arg2: memref<16x768xf32, #tpu.memory_space<vmem>>, %arg3: memref<1x1xf32, #tpu.memory_space<smem>>, %arg4: memref<16x128xf32, #tpu.memory_space<vmem>>, %arg5: memref<16x128xf32, #tpu.memory_space<vmem>>) attributes {dimension_semantics = [#tpu.dimension_semantics<arbitrary>], iteration_bounds = array<i64: 1>, scalar_prefetch = 0 : i64, scratch_operands = 2 : i64, tpu.core_type = #tpu.core_type<tc>, window_params = [{transform_indices = @transform_0, window_bounds = array<i64: 16, 512>}, {transform_indices = @transform_1, window_bounds = array<i64: 16, 768>}, {transform_indices = @transform_2, window_bounds = array<i64: 1, 1>}]} {
    %c0 = arith.constant 0 : index
    %c0_0 = arith.constant 0 : index
    %0 = vector.load %arg1[%c0, %c0_0] : memref<16x512xf32, #tpu.memory_space<vmem>>, vector<16x512xf32>
    %c0_1 = arith.constant 0 : index
    %c0_2 = arith.constant 0 : index
    %1 = vector.load %arg2[%c0_1, %c0_2] : memref<16x768xf32, #tpu.memory_space<vmem>>, vector<16x768xf32>
    %2 = vector.extract_strided_slice %0 {offsets = [0, 0], sizes = [16, 128], strides = [1, 1]} : vector<16x512xf32> to vector<16x128xf32>
    %3 = vector.extract_strided_slice %0 {offsets = [0, 128], sizes = [16, 128], strides = [1, 1]} : vector<16x512xf32> to vector<16x128xf32>
    %4 = arith.addf %2, %3 : vector<16x128xf32>
    %5 = vector.extract_strided_slice %0 {offsets = [0, 256], sizes = [16, 128], strides = [1, 1]} : vector<16x512xf32> to vector<16x128xf32>
    %6 = arith.addf %4, %5 : vector<16x128xf32>
    %7 = vector.extract_strided_slice %0 {offsets = [0, 384], sizes = [16, 128], strides = [1, 1]} : vector<16x512xf32> to vector<16x128xf32>
    %8 = arith.addf %6, %7 : vector<16x128xf32>
    %cst = arith.constant 2.500000e-01 : f32
    %9 = vector.broadcast %cst : f32 to vector<16x128xf32>
    %10 = arith.mulf %8, %9 : vector<16x128xf32>
    %11 = vector.extract_strided_slice %1 {offsets = [0, 0], sizes = [16, 128], strides = [1, 1]} : vector<16x768xf32> to vector<16x128xf32>
    %12 = vector.extract_strided_slice %1 {offsets = [0, 128], sizes = [16, 128], strides = [1, 1]} : vector<16x768xf32> to vector<16x128xf32>
    %13 = arith.addf %11, %12 : vector<16x128xf32>
    %14 = vector.extract_strided_slice %1 {offsets = [0, 256], sizes = [16, 128], strides = [1, 1]} : vector<16x768xf32> to vector<16x128xf32>
    %15 = arith.addf %13, %14 : vector<16x128xf32>
    %16 = vector.extract_strided_slice %1 {offsets = [0, 384], sizes = [16, 128], strides = [1, 1]} : vector<16x768xf32> to vector<16x128xf32>
    %17 = arith.addf %15, %16 : vector<16x128xf32>
    %18 = vector.extract_strided_slice %1 {offsets = [0, 512], sizes = [16, 128], strides = [1, 1]} : vector<16x768xf32> to vector<16x128xf32>
    %19 = arith.addf %17, %18 : vector<16x128xf32>
    %20 = vector.extract_strided_slice %1 {offsets = [0, 640], sizes = [16, 128], strides = [1, 1]} : vector<16x768xf32> to vector<16x128xf32>
    %21 = arith.addf %19, %20 : vector<16x128xf32>
    %cst_3 = arith.constant 0.166666672 : f32
    %22 = vector.broadcast %cst_3 : f32 to vector<16x128xf32>
    %23 = arith.mulf %21, %22 : vector<16x128xf32>
    %24 = arith.mulf %10, %10 : vector<16x128xf32>
    %cst_4 = arith.constant dense<0.000000e+00> : vector<16xf32>
    %25 = vector.multi_reduction <add>, %24, %cst_4 [1] : vector<16x128xf32> to vector<16xf32>
    %26 = vector.shape_cast %25 : vector<16xf32> to vector<16x1xf32>
    %27 = arith.mulf %23, %23 : vector<16x128xf32>
    %cst_5 = arith.constant dense<0.000000e+00> : vector<16xf32>
    %28 = vector.multi_reduction <add>, %27, %cst_5 [1] : vector<16x128xf32> to vector<16xf32>
    %29 = vector.shape_cast %28 : vector<16xf32> to vector<16x1xf32>
    %cst_6 = arith.constant 1.000000e-16 : f32
    %30 = vector.broadcast %cst_6 : f32 to vector<16x1xf32>
    %31 = arith.addf %26, %30 : vector<16x1xf32>
    %32 = math.rsqrt %31 : vector<16x1xf32>
    %33 = vector.broadcast %32 : vector<16x1xf32> to vector<16x128xf32>
    %34 = arith.mulf %10, %33 : vector<16x128xf32>
    %cst_7 = arith.constant 1.000000e-16 : f32
    %35 = vector.broadcast %cst_7 : f32 to vector<16x1xf32>
    %36 = arith.addf %29, %35 : vector<16x1xf32>
    %37 = math.rsqrt %36 : vector<16x1xf32>
    %38 = vector.broadcast %37 : vector<16x1xf32> to vector<16x128xf32>
    %39 = arith.mulf %23, %38 : vector<16x128xf32>
    %c16_i32 = arith.constant 16 : i32
    %40 = arith.muli %arg0, %c16_i32 : i32
    %41 = tpu.assume_multiple %40, 16 : i32
    %42 = arith.index_cast %41 : i32 to index
    %c0_8 = arith.constant 0 : index
    %43 = vector.load %arg4[%42, %c0_8] : memref<16x128xf32, #tpu.memory_space<vmem>>, vector<16x128xf32>
    tpu.vector_store %arg4[%42, %c0_8], %34 {strides = array<i32>} : memref<16x128xf32, #tpu.memory_space<vmem>>, vector<16x128xf32>,
    %44 = arith.index_cast %41 : i32 to index
    %c0_9 = arith.constant 0 : index
    %45 = vector.load %arg5[%44, %c0_9] : memref<16x128xf32, #tpu.memory_space<vmem>>, vector<16x128xf32>
    tpu.vector_store %arg5[%44, %c0_9], %39 {strides = array<i32>} : memref<16x128xf32, #tpu.memory_space<vmem>>, vector<16x128xf32>,
    %c0_i32 = arith.constant 0 : i32
    %46 = arith.cmpi eq, %arg0, %c0_i32 : i32
    %47 = arith.extui %46 : i1 to i32
    %c0_i32_10 = arith.constant 0 : i32
    %48 = arith.cmpi ne, %47, %c0_i32_10 : i32
    scf.if %48 {
      %c0_11 = arith.constant 0 : index
      %c0_12 = arith.constant 0 : index
      %49 = vector.load %arg4[%c0_11, %c0_12] : memref<16x128xf32, #tpu.memory_space<vmem>>, vector<16x128xf32>
      %c0_13 = arith.constant 0 : index
      %c0_14 = arith.constant 0 : index
      %50 = vector.load %arg5[%c0_13, %c0_14] : memref<16x128xf32, #tpu.memory_space<vmem>>, vector<16x128xf32>
      %cst_15 = arith.constant dense<0.000000e+00> : vector<16x16xf32>
      %51 = tpu.matmul %49, %50, %cst_15 {dimension_numbers = #tpu.dot_dimension_numbers<[1], [1], [0], [0], [0, 0, 1, 0], [], []>} : vector<16x128xf32>, vector<16x128xf32>, vector<16x16xf32> -> vector<16x16xf32>
      %52 = arith.mulf %49, %50 : vector<16x128xf32>
      %cst_16 = arith.constant dense<0.000000e+00> : vector<16xf32>
      %53 = vector.multi_reduction <add>, %52, %cst_16 [1] : vector<16x128xf32> to vector<16xf32>
      %54 = vector.shape_cast %53 : vector<16xf32> to vector<16x1xf32>
      %55 = tpu.iota {dimensions = array<i32: 0>} : vector<16x16xi32>
      %56 = tpu.iota {dimensions = array<i32: 1>} : vector<16x16xi32>
      %57 = arith.cmpi eq, %55, %56 : vector<16x16xi32>
      %cst_17 = arith.constant 0.000000e+00 : f32
      %58 = vector.broadcast %cst_17 : f32 to vector<16x16xf32>
      %59 = arith.addf %58, %51 : vector<16x16xf32>
      %60 = vector.broadcast %54 : vector<16x1xf32> to vector<16x16xf32>
      %61 = arith.subf %59, %60 : vector<16x16xf32>
      %cst_18 = arith.constant 0.000000e+00 : f32
      %62 = vector.broadcast %cst_18 : f32 to vector<16x16xf32>
      %63 = arith.maximumf %61, %62 : vector<16x16xf32>
      %cst_19 = arith.constant 0.000000e+00 : f32
      %64 = vector.broadcast %cst_19 : f32 to vector<16x16xf32>
      %65 = arith.select %57, %64, %63 : vector<16x16xi1>, vector<16x16xf32>
      %cst_20 = arith.constant 0.000000e+00 : f32
      %66 = vector.broadcast %cst_20 : f32 to vector<16x16xf32>
      %67 = arith.addf %66, %51 : vector<16x16xf32>
      %68 = tpu.transpose %54, [1, 0] : vector<16x1xf32> -> vector<1x16xf32>
      %69 = vector.broadcast %68 : vector<1x16xf32> to vector<16x16xf32>
      %70 = arith.subf %67, %69 : vector<16x16xf32>
      %cst_21 = arith.constant 0.000000e+00 : f32
      %71 = vector.broadcast %cst_21 : f32 to vector<16x16xf32>
      %72 = arith.maximumf %70, %71 : vector<16x16xf32>
      %cst_22 = arith.constant 0.000000e+00 : f32
      %73 = vector.broadcast %cst_22 : f32 to vector<16x16xf32>
      %74 = arith.select %57, %73, %72 : vector<16x16xi1>, vector<16x16xf32>
      %cst_23 = arith.constant dense<0xFF800000> : vector<16xf32>
      %75 = vector.multi_reduction <maximumf>, %65, %cst_23 [1] : vector<16x16xf32> to vector<16xf32>
      %76 = vector.shape_cast %75 : vector<16xf32> to vector<16x1xf32>
      %77 = vector.shape_cast %76 : vector<16x1xf32> to vector<1x16x1xf32>
      %cst_24 = arith.constant dense<0.000000e+00> : vector<1xf32>
      %78 = vector.multi_reduction <add>, %77, %cst_24 [1, 2] : vector<1x16x1xf32> to vector<1xf32>
      %79 = vector.shape_cast %78 : vector<1xf32> to vector<1x1x1xf32>
      %80 = vector.extract %79[0, 0, 0] : f32 from vector<1x1x1xf32>
      %cst_25 = arith.constant dense<0xFF800000> : vector<16xf32>
      %81 = vector.multi_reduction <maximumf>, %74, %cst_25 [0] : vector<16x16xf32> to vector<16xf32>
      %82 = vector.shape_cast %81 : vector<16xf32> to vector<1x16xf32>
      %83 = vector.shape_cast %82 : vector<1x16xf32> to vector<1x1x16xf32>
      %cst_26 = arith.constant dense<0.000000e+00> : vector<1xf32>
      %84 = vector.multi_reduction <add>, %83, %cst_26 [1, 2] : vector<1x1x16xf32> to vector<1xf32>
      %85 = vector.shape_cast %84 : vector<1xf32> to vector<1x1x1xf32>
      %86 = vector.extract %85[0, 0, 0] : f32 from vector<1x1x1xf32>
      %87 = arith.addf %80, %86 : f32
      %c0_27 = arith.constant 0 : index
      %c0_28 = arith.constant 0 : index
      %88 = memref.load %arg3[%c0_27, %c0_28] : memref<1x1xf32, #tpu.memory_space<smem>>
      memref.store %87, %arg3[%c0_27, %c0_28] : memref<1x1xf32, #tpu.memory_space<smem>>
    } else {
    }
    return
  }
  func.func @transform_0(%arg0: i32) -> (i32, i32) {
    %c0_i32 = arith.constant 0 : i32
    %c0_i32_0 = arith.constant 0 : i32
    return %arg0, %c0_i32 : i32, i32
  }
  func.func @transform_1(%arg0: i32) -> (i32, i32) {
    %c0_i32 = arith.constant 0 : i32
    %c0_i32_0 = arith.constant 0 : i32
    return %arg0, %c0_i32 : i32, i32
  }
  func.func @transform_2(%arg0: i32) -> (i32, i32) {
    %c0_i32 = arith.constant 0 : i32
    %c0_i32_0 = arith.constant 0 : i32
    %c0_i32_1 = arith.constant 0 : i32
    return %c0_i32, %c0_i32_0 : i32, i32
  }
}

</mosaic_0001>

<bundles_post_ra>
// kernel: tpu_custom_call.1
= control target key start
LH: loop header
LB: loop body
LE: loop exit
PB: predicated region body
PF: predicated region fallthrough
CT: control target
= control target key end

     0   :  { %7 = vsyncpa [#allocation5], 0  ;;  %s474_s0 = inlined_call_operand.hbm [shape: f32[16,512], index: 0, kind: input, shape index: {}]   ;;  %s475_s1 = inlined_call_operand.hbm [shape: f32[16,768], index: 1, kind: input, shape index: {}]   ;;  %s476_s2 = inlined_call_operand.hbm [shape: f32[1,1], index: 2, kind: output, shape index: {}]  }
   0x1   :  { %8 = vsyncpa [#allocation8], 0 }
   0x2   :  { %9 = vsyncpa [#allocation6], 0  ;;  %s408_s9 = smov [#allocation4]   ;;  %s348_s13 = scalar_lea.hbm %s474_s0, 1024 }
   0x3   :  { %s15_s10 = sshll.u32 %s408_s9, 4  ;;  %p349_p0 = scmp.ne.s32.totalorder %s474_s0, %s348_s13  ;;  %s16_s10 = int_to_ptr.vmem [resolvable:$true] %s15_s10 }
   0x4   :  { %p352_p1 = scmp.lt.u32.totalorder %s348_s13, %s474_s0 }
   0x6   :  { %p354_p2 = pnand %p352_p1, %p349_p0 }
   0x8   :  { %357 = shalt.err (!%p354_p2)
}
   0x9   :  { %s358_s18 = scalar_lea.vmem %s16_s10, 1024  ;;  %p363_p4 = scmp.lt.s32.totalorder %s16_s10, %s16_s10 }
   0xa   :  { %p359_p3 = scmp.ne.s32.totalorder %s16_s10, %s358_s18  ;;  %p364_p5 = scmp.lt.s32.totalorder %s358_s18, %s358_s18 }
   0xc   :  { %p365_p6 = por %p364_p5, %p363_p4 }
   0xe   :  { %p366_p7 = pnand %p365_p6, %p359_p3 }
  0x10   :  { %369 = shalt.err (!%p366_p7)
}
  0x11   :  { %s409_s19 = smov 512   ;;  %s410_s20 = smov 32  }
  0x12   :  { %21 = dma.hbm_to_vmem [thread:$0]  %s474_s0, 1024, %s16_s10, [#allocation5], %s409_s19, %s409_s19, %s410_s20  }
  0x13   :  { %s411_s23 = smov [#allocation7]   ;;  %s370_s27 = scalar_lea.hbm %s475_s1, 1536 }
  0x14   :  { %s27_s24 = sshll.u32 %s411_s23, 4  ;;  %p371_p8 = scmp.ne.s32.totalorder %s475_s1, %s370_s27  ;;  %s28_s24 = int_to_ptr.vmem [resolvable:$true] %s27_s24 }
  0x15   :  { %p374_p9 = scmp.lt.u32.totalorder %s370_s27, %s475_s1 }
  0x17   :  { %p376_p10 = pnand %p374_p9, %p371_p8 }
  0x19   :  { %379 = shalt.err (!%p376_p10)
}
  0x1a   :  { %s380_s4 = scalar_lea.vmem %s28_s24, 1536  ;;  %p385_p12 = scmp.lt.s32.totalorder %s28_s24, %s28_s24 }
  0x1b   :  { %p381_p11 = scmp.ne.s32.totalorder %s28_s24, %s380_s4  ;;  %p386_p13 = scmp.lt.s32.totalorder %s380_s4, %s380_s4 }
  0x1d   :  { %p387_p0 = por %p386_p13, %p385_p12 }
  0x1f   :  { %p388_p1 = pnand %p387_p0, %p381_p11 }
  0x21   :  { %391 = shalt.err (!%p388_p1)
}
  0x22   :  { %s412_s0 = smov 768   ;;  %s413_s5 = smov 48  }
  0x23   :  { %33 = dma.hbm_to_vmem [thread:$0]  %s475_s1, 1536, %s28_s24, [#allocation8], %s412_s0, %s412_s0, %s413_s5  }
  0x24   :  { %402 = dma.done.wait [#allocation5], 1024  }
  0x25   :  { %403 = vsyncadd [#allocation5], 4294966272 }
  0x26   :  { %404 = dma.done.wait [#allocation8], 1536  }
  0x27   :  { %405 = vsyncadd [#allocation8], 4294965760  ;;  %v48_v0 = vld [vmem:[#allocation7] sm:$0xff]  ;;  %v49_v1 = vld [vmem:[#allocation7 + $0x8] sm:$0xff]  ;;  %v125_v63 = vlaneseq  ;;  %vm255_vm1 = vcmask 130048   ;;  %vm262_vm3 = vcmask 7168  }
  0x28   :  { %v50_v2 = vld [vmem:[#allocation7 + $0x10] sm:$0xff]  ;;  %v51_v3 = vld [vmem:[#allocation7 + $0x18] sm:$0xff]  ;;  %v68_v4 = vadd.f32 %v49_v1, %v48_v0  ;;  %v40_v5 = vld [vmem:[#allocation4] sm:$0xff]  ;;  %vm284_vm4 = vcmask 122880   ;;  %s392_s12 = scalar_lea.hbm %s476_s2, 16 }
  0x29   :  { %v41_v6 = vld [vmem:[#allocation4 + $0x8] sm:$0xff]  ;;  %v42_v7 = vld [vmem:[#allocation4 + $0x10] sm:$0xff]  ;;  %v55_v11 = vld [vmem:[#allocation7 + $0x38] sm:$0xff]  ;;  %v126_v0 = vshrl.u32 %v125_v63, 7  ;;  %p393_p2 = scmp.ne.s32.totalorder %s476_s2, %s392_s12  ;;  %p396_p3 = scmp.lt.u32.totalorder %s392_s12, %s476_s2 }
  0x2a   :  { %v70_v8 = vadd.f32 %v68_v4, %v50_v2  ;;  %v60_v9 = vadd.f32 %v41_v6, %v40_v5  ;;  %v54_v10 = vld [vmem:[#allocation7 + $0x30] sm:$0xff]  ;;  %v52_v12 = vld [vmem:[#allocation7 + $0x20] sm:$0xff]  ;;  %v43_v13 = vld [vmem:[#allocation4 + $0x18] sm:$0xff]  ;;  %v129_v2 = vand.u32 127, %v125_v63 }
  0x2b   :  { %v56_v14 = vld [vmem:[#allocation7 + $0x40] sm:$0xff]  ;;  %v69_v15 = vadd.f32 %v55_v11, %v54_v10  ;;  %v57_v18 = vld [vmem:[#allocation7 + $0x48] sm:$0xff]  ;;  %v46_v23 = vld [vmem:[#allocation4 + $0x30] sm:$0xff]  ;;  %v127_v1 = vadd.s32 8, %v126_v0  ;;  %p398_p4 = pnand %p396_p3, %p393_p2 }
  0x2c   :  { %v72_v16 = vadd.f32 %v70_v8, %v51_v3  ;;  %v62_v17 = vadd.f32 %v60_v9, %v42_v7  ;;  %v44_v19 = vld [vmem:[#allocation4 + $0x20] sm:$0xff]  ;;  %v45_v20 = vld [vmem:[#allocation4 + $0x28] sm:$0xff]  ;;  %v58_v27 = vld [vmem:[#allocation7 + $0x50] sm:$0xff]  ;;  %vm130_vm2 = vcmp.eq.s32.totalorder %v126_v0, %v129_v2 }
  0x2d   :  { %v53_v21 = vld [vmem:[#allocation7 + $0x28] sm:$0xff]  ;;  %v71_v22 = vadd.f32 %v69_v15, %v56_v14  ;;  %v61_v24 = vadd.f32 %v45_v20, %v44_v19  ;;  %v47_v28 = vld [vmem:[#allocation4 + $0x38] sm:$0xff]  ;;  %vm131_vm0 = vcmp.eq.s32.totalorder %v127_v1, %v129_v2  ;;  %v247_v20 = vsub.s32 0, %v126_v0 }
  0x2e   :  { %v74_v25 = vadd.f32 %v72_v16, %v52_v12  ;;  %v64_v26 = vadd.f32 %v62_v17, %v43_v13  ;;  %v59_v33 = vld [vmem:[#allocation7 + $0x58] sm:$0xff] }
  0x2f   :  { %v73_v29 = vadd.f32 %v71_v22, %v57_v18  ;;  %v63_v30 = vadd.f32 %v61_v24, %v46_v23 }
  0x30   :  { %v76_v31 = vadd.f32 %v74_v25, %v53_v21  ;;  %v66_v32 = vmul.f32 0.25, %v64_v26 }
  0x31   :  { %v75_v34 = vadd.f32 %v73_v29, %v58_v27  ;;  %v65_v35 = vadd.f32 %v63_v30, %v47_v28 }
  0x32   :  { %v78_v36 = vmul.f32 0.16666667, %v76_v31  ;;  %v80_v37 = vmul.f32 %v66_v32, %v66_v32 }
  0x33   :  { %v77_v38 = vadd.f32 %v75_v34, %v59_v33  ;;  %v67_v39 = vmul.f32 0.25, %v65_v35 }
  0x34   :  { %v86_v40 = vmul.f32 %v78_v36, %v78_v36  ;;  %82 = vadd.xlane.f32.xlu1 %v80_v37 }
  0x35   :  { %v79_v41 = vmul.f32 0.16666667, %v77_v38  ;;  %v81_v42 = vmul.f32 %v67_v39, %v67_v39 }
  0x36   :  { %88 = vadd.xlane.f32.xlu0 %v86_v40 }
  0x37   :  { %v87_v43 = vmul.f32 %v79_v41, %v79_v41 }
  0x38   :  { %84 = vadd.xlane.f32.xlu1 %v81_v42 }
  0x3a   :  { %90 = vadd.xlane.f32.xlu0 %v87_v43 }
  0xc1   :  { %v83_v44 = vpop.xlane.xlu1 %82 }
  0xc2   :  { %v92_v45 = vadd.f32 1e-16, %v83_v44 }
  0xc3   :  { %v89_v46 = vpop.xlane.xlu0 %88 }
  0xc4   :  { %v98_v47 = vadd.f32 1e-16, %v89_v46  ;;  %340 = vrsqrt.f32 %v92_v45 }
  0xc5   :  { %v85_v48 = vpop.xlane.xlu1 %84 }
  0xc6   :  { %342 = vrsqrt.f32 %v98_v47  ;;  %v93_v49 = vadd.f32 1e-16, %v85_v48 }
  0xc7   :  { %v91_v50 = vpop.xlane.xlu0 %90 }
  0xc8   :  { %v99_v51 = vadd.f32 1e-16, %v91_v50  ;;  %344 = vrsqrt.f32 %v93_v49 }
  0xca   :  { %346 = vrsqrt.f32 %v99_v51 }
  0xce   :  { %v341_v52 = vpop.eup %340 }
  0xcf   :  { %v96_v53 = vmul.f32 %v341_v52, %v66_v32 }
  0xd0   :  { %v343_v54 = vpop.eup %342 }
  0xd1   :  { %v102_v55 = vmul.f32 %v343_v54, %v78_v36  ;;  %321 = vmatprep.mubr.f32.mxu0 %v96_v53 }
  0xd2   :  { %v345_v56 = vpop.eup %344 }
  0xd3   :  { %v119_v57 = vmul.f32 %v102_v55, %v96_v53  ;;  %v97_v58 = vmul.f32 %v345_v56, %v67_v39 }
  0xd4   :  { %v347_v59 = vpop.eup %346 }
  0xd5   :  { %121 = vadd.xlane.f32.xlu0 %v119_v57  ;;  %v103_v60 = vmul.f32 %v347_v59, %v79_v41 }
  0xd7   :  { %v324_v61 = vpack.c.bf16 %v103_v60, %v102_v55  ;;  %v120_v62 = vmul.f32 %v103_v60, %v97_v58 }
  0xd9   :  { %325 = vmatprep.subr.bf16.mxu0 %v324_v61  ;;  %123 = vadd.xlane.f32.xlu1 %v120_v62 }
  0xda   :  { %327 = vmatpush3.bf16.xpose.msra.mxu0 %v324_v61 }
  0xe1   :  { %322 = vmatmul.mubr.f32.vlgmr.msra.gmra.mrb[0].mxu0 %v97_v58 }
 0x162   :  { %v122_v5 = vpop.xlane.xlu0 %121 }
 0x166   :  { %v124_v3 = vpop.xlane.xlu1 %123 }
 0x1b4   :  { %v323_v4 = vpop.f32.mrb[0].mxu0 }
 0x1b5   :  { %v208_v6 = vsub.f32 %v323_v4, %v124_v3  ;;  %v198_v7 = vpop.f32.mrb[1].mxu0 }
 0x1b6   :  { %v207_v8 = vsub.f32 %v198_v7, %v122_v5 }
 0x1b7   :  { %v210_v9 = vmax.f32 %v208_v6, 0.0 }
 0x1b8   :  { %v209_v10 = vmax.f32 %v207_v8, 0.0 }
 0x1b9   :  { %v212_v11 = vsel %vm131_vm0, 0.0, %v210_v9 }
 0x1ba   :  { %v259_v12 = vsel %vm255_vm1, %v212_v11, -inf  ;;  %v211_v13 = vsel %vm130_vm2, 0.0, %v209_v10 }
 0x1bb   :  { %260 = vmax.xlane.f32.xlu1 %v259_v12  ;;  %v256_v14 = vsel %vm255_vm1, %v211_v13, -inf }
 0x1bc   :  { %257 = vmax.xlane.f32.xlu0 %v256_v14 }
 0x1e9   :  { %213 = vxpose.xlu0.b32.start [1/2] (short) (narrow) %v122_v5, 8 }
 0x1ed   :  { %214 = vxpose.xlu0.b32.end [2/2] (short) (narrow) %v124_v3, 8 }
 0x248   :  { %v261_v15 = vpop.xlane.xlu1 %260 }
 0x249   :  { %v264_v16 = vsel %vm262_vm3, %v261_v15, 0.0  ;;  %v258_v17 = vpop.xlane.xlu0 %257 }
 0x24a   :  { %v263_v18 = vsel %vm262_vm3, %v258_v17, 0.0 }
 0x24b   :  { %v265_v19 = vadd.f32 %v264_v16, %v263_v18 }
 0x24d   :  { %266 = vadd.xlane.f32.xlu1 %v265_v19 }
 0x269   :  { %v229_v21 = vpop.trf.xlu0 }
 0x26a   :  { %v248_v22 = vrot.slane %v229_v21, %v247_v20 }
 0x26c   :  { %v249_v23 = vsub.f32 %v198_v7, %v248_v22  ;;  %v250_v24 = vsub.f32 %v323_v4, %v248_v22 }
 0x26e   :  { %v251_v25 = vmax.f32 %v249_v23, 0.0  ;;  %v252_v26 = vmax.f32 %v250_v24, 0.0 }
 0x270   :  { %v253_v27 = vsel %vm130_vm2, 0.0, %v251_v25  ;;  %v254_v28 = vsel %vm131_vm0, 0.0, %v252_v26 }
 0x271   :  { %v275_v29 = vsel %vm255_vm1, %v253_v27, -inf  ;;  %v276_v30 = vsel %vm255_vm1, %v254_v28, -inf }
 0x272   :  { %v277_v31 = vmax.f32 %v275_v29, %v276_v30 }
 0x274   :  { %v278_v32 = vrot.slane %v277_v31, 4 }
 0x276   :  { %v279_v33 = vmax.f32 %v277_v31, %v278_v32 }
 0x278   :  { %v280_v34 = vrot.slane %v279_v33, 2 }
 0x27a   :  { %v281_v35 = vmax.f32 %v279_v33, %v280_v34 }
 0x27c   :  { %v282_v36 = vrot.slane %v281_v35, 1 }
 0x27e   :  { %v283_v37 = vmax.f32 %v281_v35, %v282_v36 }
 0x280   :  { %v285_v38 = vsel %vm284_vm4, %v283_v37, 0.0 }
 0x281   :  { %286 = vadd.xlane.f32.xlu1 %v285_v38 }
 0x2da   :  { %v267_v39 = vpop.xlane.xlu1 %266 }
 0x2db   :  { %v268_v40 = vrot.slane %v267_v39, 4 }
 0x2dd   :  { %v269_v41 = vadd.f32 %v268_v40, %v267_v39 }
 0x2df   :  { %v270_v42 = vrot.slane %v269_v41, 2 }
 0x2e1   :  { %v271_v43 = vadd.f32 %v270_v42, %v269_v41 }
 0x2e3   :  { %v272_v44 = vrot.slane %v271_v43, 1 }
 0x2e5   :  { %v273_v45 = vadd.f32 %v272_v44, %v271_v43 }
 0x2e7   :  { %328 = vpush %v273_v45 }
 0x30e   :  { %v287_v46 = vpop.xlane.xlu1 %286 }
 0x30f   :  { %v288_v47 = vrot.slane %v287_v46, 4 }
 0x311   :  { %v289_v48 = vadd.f32 %v288_v47, %v287_v46 }
 0x313   :  { %v290_v49 = vrot.slane %v289_v48, 2 }
 0x315   :  { %v291_v50 = vadd.f32 %v290_v49, %v289_v48 }
 0x317   :  { %v292_v51 = vrot.slane %v291_v50, 1 }
 0x318   :  { %s329_s1 = spop %328 }
 0x319   :  { %v293_v52 = vadd.f32 %v292_v51, %v291_v50 }
 0x31b   :  { %330 = vpush %v293_v52 }
 0x34c   :  { %s331_s8 = spop %330 }
 0x34d   :  { %s295_s9 = sadd.f32 %s331_s8, %s329_s1 }
 0x34f   :  { %297 = sst [smem:[#allocation9]] %s295_s9 }
 0x350   :  { %401 = shalt.err (!%p398_p4)
}
 0x351   :  { %s414_s17 = smov [#allocation9]  }
 0x352   :  { %305 = dma.smem_to_hbm %s414_s17, 16, %s476_s2, [#allocation6]  }
 0x353   :  { %406 = dma.done.wait [#allocation6], 16  }
 0x354   :  { %407 = vsyncadd [#allocation6], 4294967280 }
 0x355   :  { %309 = sfence }
 0x356   :  { %310 = vsyncpa [#allocation5], 1 }
 0x357   :  { %311 = vsyncpa [#allocation8], 1 }
 0x358   :  { %312 = vsyncpa [#allocation6], 1 }

</bundles_post_ra>
